<compile_context>
chip_gen: v6e
topology: v6e:2x2x1
jax: 0.10.0
libtpu: 0.0.40
codegen_flags: <defaults>
</compile_context>

<pallas_src>
import jax
import jax.numpy as jnp
from jax.experimental import pallas as pl
from jax.experimental.pallas import tpu as pltpu


def attn_kernel(hidden_ref, objs_ref, w_ref, out_ref):
    # hidden_ref: (bb, H)   objs_ref: (bb, N, H)   w_ref: (H, H)  (out x in)
    # out_ref:    (bb, N)   -- softmax over the N (num_objs) axis
    hidden = hidden_ref[...].astype(jnp.float32)
    objs = objs_ref[...].astype(jnp.float32)
    w = w_ref[...].astype(jnp.float32)

    # u[b, h] = sum_o hidden[b, o] * W[o, h]   (single vmatmul push; keep in-kernel)
    u = jnp.dot(hidden, w, preferred_element_type=jnp.float32)        # (bb, H)

    # scores[b, n] = sum_h objs[b, n, h] * u[b, h]
    scores = jnp.sum(objs * u[:, None, :], axis=-1)                   # (bb, N)

    # Numerically-stable softmax over num_objs, all in f32.
    m = jnp.max(scores, axis=-1, keepdims=True)
    p = jnp.exp(scores - m)
    denom = jnp.sum(p, axis=-1, keepdims=True)
    # Exact divide keeps bit-closeness at tiny N; at N in the hundreds switch to
    # p * pl.reciprocal(denom) to move the divide off the VALU slot to the EUP.
    out_ref[...] = (p / denom).astype(out_ref.dtype)


def _pick_batch_block(batch):
    """Batch tile size.  Small B -> single grid step (grid overhead ~0.35us/step
    dominates at toy sizes).  Large, 8-divisible B -> tile so each step is
    sublane-friendly and v7x can shard the 'parallel' axis across its 2 TCs."""
    if batch <= 512 or batch % 8 != 0:
        return batch
    for cand in (512, 256, 128, 64, 32, 16, 8):
        if batch % cand == 0:
            return cand
    return batch


def attn_general(hidden, objs, weight, bias=None):
    """hidden: (B, H), objs: (B, N, H), weight: (H, H), bias: (H,) -> (B, 1, N).

    `bias` is accepted to match nn.Linear's interface but is unused: it only
    contributes a per-batch constant to the scores, which softmax cancels.
    """
    del bias
    B, N, H = objs.shape
    assert hidden.shape == (B, H) and weight.shape == (H, H)

    out_dtype = jnp.result_type(hidden.dtype, objs.dtype, weight.dtype)
    bb = _pick_batch_block(B)
    grid = (pl.cdiv(B, bb),)

    itemsize = jnp.dtype(out_dtype).itemsize
    cost = pl.CostEstimate(
        flops=2 * B * H * H + 2 * B * N * H,
        transcendentals=B * N,
        bytes_accessed=itemsize * (B * N * H + H * H + B * H + B * N),
    )

    probs = pl.pallas_call(
        attn_kernel,
        out_shape=jax.ShapeDtypeStruct((B, N), out_dtype),
        grid_spec=pltpu.PrefetchScalarGridSpec(
            num_scalar_prefetch=0,
            grid=grid,
            in_specs=[
                pl.BlockSpec((bb, H), lambda b: (b, 0)),        # hidden tile
                pl.BlockSpec((bb, N, H), lambda b: (b, 0, 0)),  # objs tile
                pl.BlockSpec((H, H), lambda b: (0, 0)),         # weight (resident)
            ],
            out_specs=pl.BlockSpec((bb, N), lambda b: (b, 0)),
        ),
        compiler_params=pltpu.CompilerParams(
            dimension_semantics=("parallel",),  # lets v7x use both TensorCores
        ),
        cost_estimate=cost,
    )(hidden, objs, weight)

    return probs[:, None, :]  # (B, 1, N)


def attn_reference(hidden, objs, weight, bias):
    energy = jnp.einsum("bnh,oh->bno", objs, weight) + bias[None, None, :]
    scores = jnp.einsum("bnh,bh->bn", energy, hidden)
    return jax.nn.softmax(scores, axis=1)[:, None, :]


if __name__ == "__main__":
    B, N, H = 2, 8, 32  # batch, num_objs, hidden_size

    key = jax.random.PRNGKey(0)
    k_h, k_o, k_w, k_b = jax.random.split(key, 4)

    hidden = jax.random.normal(k_h, (B, H), dtype=jnp.float32)
    objs = jax.random.normal(k_o, (B, N, H), dtype=jnp.float32)
    # deterministic "nn.Linear(hidden_size, hidden_size)" params
    weight = jax.random.normal(k_w, (H, H), dtype=jnp.float32) * (1.0 / jnp.sqrt(H))
    bias = jax.random.normal(k_b, (H,), dtype=jnp.float32) * 0.01

    out = attn_general(hidden, objs, weight, bias)
    out = jax.block_until_ready(out)

    ref = attn_reference(hidden, objs, weight, bias)
    assert out.shape == (B, 1, N)
    assert jnp.allclose(out, ref, atol=1e-5, rtol=1e-5), "mismatch vs reference"

    print("KERNEL_OK")
</pallas_src>

<mosaic_0001>
module attributes {stable_mosaic.version = 11 : i64} {
  func.func @attn_kernel(%arg0: i32, %arg1: memref<2x32xf32, #tpu.memory_space<vmem>>, %arg2: memref<2x8x32xf32, #tpu.memory_space<vmem>>, %arg3: memref<32x32xf32, #tpu.memory_space<vmem>>, %arg4: memref<2x8xf32, #tpu.memory_space<vmem>>) attributes {dimension_semantics = [#tpu.dimension_semantics<parallel>], iteration_bounds = array<i64: 1>, scalar_prefetch = 0 : i64, scratch_operands = 0 : i64, tpu.core_type = #tpu.core_type<tc>, window_params = [{transform_indices = @transform_0, window_bounds = array<i64: 2, 32>}, {transform_indices = @transform_1, window_bounds = array<i64: 2, 8, 32>}, {pipeline_mode = #tpu.pipeline_mode<synchronous>, transform_indices = @transform_2, window_bounds = array<i64: 32, 32>}, {transform_indices = @transform_3, window_bounds = array<i64: 2, 8>}]} {
    %c0 = arith.constant 0 : index
    %c0_0 = arith.constant 0 : index
    %0 = vector.load %arg1[%c0, %c0_0] : memref<2x32xf32, #tpu.memory_space<vmem>>, vector<2x32xf32>
    %c0_1 = arith.constant 0 : index
    %c0_2 = arith.constant 0 : index
    %c0_3 = arith.constant 0 : index
    %1 = vector.load %arg2[%c0_1, %c0_2, %c0_3] : memref<2x8x32xf32, #tpu.memory_space<vmem>>, vector<2x8x32xf32>
    %c0_4 = arith.constant 0 : index
    %c0_5 = arith.constant 0 : index
    %2 = vector.load %arg3[%c0_4, %c0_5] : memref<32x32xf32, #tpu.memory_space<vmem>>, vector<32x32xf32>
    %cst = arith.constant dense<0.000000e+00> : vector<2x32xf32>
    %3 = tpu.matmul %0, %2, %cst {dimension_numbers = #tpu.dot_dimension_numbers<[1], [0], [0], [1], [0, 0, 1, 1], [], []>} : vector<2x32xf32>, vector<32x32xf32>, vector<2x32xf32> -> vector<2x32xf32>
    %4 = vector.shape_cast %3 : vector<2x32xf32> to vector<2x1x32xf32>
    %5 = vector.broadcast %4 : vector<2x1x32xf32> to vector<2x8x32xf32>
    %6 = arith.mulf %1, %5 : vector<2x8x32xf32>
    %cst_6 = arith.constant dense<0.000000e+00> : vector<2x8xf32>
    %7 = vector.multi_reduction <add>, %6, %cst_6 [2] : vector<2x8x32xf32> to vector<2x8xf32>
    %cst_7 = arith.constant dense<0xFF800000> : vector<2xf32>
    %8 = vector.multi_reduction <maximumf>, %7, %cst_7 [1] : vector<2x8xf32> to vector<2xf32>
    %9 = vector.shape_cast %8 : vector<2xf32> to vector<2x1xf32>
    %10 = vector.broadcast %9 : vector<2x1xf32> to vector<2x8xf32>
    %11 = arith.subf %7, %10 : vector<2x8xf32>
    %12 = math.exp %11 : vector<2x8xf32>
    %cst_8 = arith.constant dense<0.000000e+00> : vector<2xf32>
    %13 = vector.multi_reduction <add>, %12, %cst_8 [1] : vector<2x8xf32> to vector<2xf32>
    %14 = vector.shape_cast %13 : vector<2xf32> to vector<2x1xf32>
    %15 = vector.broadcast %14 : vector<2x1xf32> to vector<2x8xf32>
    %16 = arith.divf %12, %15 : vector<2x8xf32>
    %c0_9 = arith.constant 0 : index
    %c0_10 = arith.constant 0 : index
    %17 = vector.load %arg4[%c0_9, %c0_10] : memref<2x8xf32, #tpu.memory_space<vmem>>, vector<2x8xf32>
    tpu.vector_store %arg4[%c0_9, %c0_10], %16 {strides = array<i32>} : memref<2x8xf32, #tpu.memory_space<vmem>>, vector<2x8xf32>,
    return
  }
  func.func @transform_0(%arg0: i32) -> (i32, i32) {
    %c0_i32 = arith.constant 0 : i32
    %c0_i32_0 = arith.constant 0 : i32
    return %arg0, %c0_i32 : i32, i32
  }
  func.func @transform_1(%arg0: i32) -> (i32, i32, i32) {
    %c0_i32 = arith.constant 0 : i32
    %c0_i32_0 = arith.constant 0 : i32
    %c0_i32_1 = arith.constant 0 : i32
    return %arg0, %c0_i32, %c0_i32_0 : i32, i32, i32
  }
  func.func @transform_2(%arg0: i32) -> (i32, i32) {
    %c0_i32 = arith.constant 0 : i32
    %c0_i32_0 = arith.constant 0 : i32
    %c0_i32_1 = arith.constant 0 : i32
    return %c0_i32, %c0_i32_0 : i32, i32
  }
  func.func @transform_3(%arg0: i32) -> (i32, i32) {
    %c0_i32 = arith.constant 0 : i32
    %c0_i32_0 = arith.constant 0 : i32
    return %arg0, %c0_i32 : i32, i32
  }
}

</mosaic_0001>

<bundles_post_ra>
// kernel: tpu_custom_call.1
= control target key start
LH: loop header
LB: loop body
LE: loop exit
PB: predicated region body
PF: predicated region fallthrough
CT: control target
= control target key end

     0   :  { %8 = vsyncpa [#allocation3], 0  ;;  %s457_s0 = inlined_call_operand.hbm [shape: f32[2,32], index: 0, kind: input, shape index: {}]   ;;  %s458_s1 = inlined_call_operand.hbm [shape: f32[2,8,32], index: 1, kind: input, shape index: {}]   ;;  %s459_s2 = inlined_call_operand.hbm [shape: f32[32,32], index: 2, kind: input, shape index: {}]   ;;  %s460_s3 = inlined_call_operand.hbm [shape: f32[2,8], index: 3, kind: output, shape index: {}]  }
   0x1   :  { %9 = vsyncpa [#allocation6], 0 }
   0x2   :  { %10 = vsyncpa [#allocation4], 0  ;;  %s406_s12 = smov [#allocation5]  }
   0x3   :  { %s26_s13 = sshll.u32 %s406_s12, 4  ;;  %s27_s13 = int_to_ptr.vmem [resolvable:$true] %s26_s13 }
   0x4   :  { %s328_s14 = scalar_lea.vmem %s27_s13, 256  ;;  %p333_p1 = scmp.lt.s32.totalorder %s27_s13, %s27_s13 }
   0x5   :  { %p329_p0 = scmp.ne.s32.totalorder %s27_s13, %s328_s14  ;;  %p334_p2 = scmp.lt.s32.totalorder %s328_s14, %s328_s14 }
   0x7   :  { %p335_p3 = por %p334_p2, %p333_p1 }
   0x9   :  { %p336_p4 = pnand %p335_p3, %p329_p0 }
   0xb   :  { %339 = shalt.err (!%p336_p4)
}
   0xc   :  { %s407_s15 = smov 128   ;;  %s408_s16 = smov 8  }
   0xd   :  { %32 = dma.hbm_to_vmem [thread:$0]  %s458_s1, 256, %s27_s13, [#allocation6], %s407_s15, %s407_s15, %s408_s16  }
   0xe   :  { %s409_s19 = smov [#allocation2]   ;;  %s410_s21 = smov [#allocation7]  }
   0xf   :  { %s17_s20 = sshll.u32 %s409_s19, 4  ;;  %s38_s22 = sshll.u32 %s410_s21, 4  ;;  %s18_s20 = int_to_ptr.vmem [resolvable:$true] %s17_s20  ;;  %s39_s22 = int_to_ptr.vmem [resolvable:$true] %s38_s22 }
  0x10   :  { %s348_s23 = scalar_lea.vmem %s18_s20, 32  ;;  %p353_p6 = scmp.lt.s32.totalorder %s18_s20, %s18_s20 }
  0x11   :  { %p349_p5 = scmp.ne.s32.totalorder %s18_s20, %s348_s23  ;;  %p354_p7 = scmp.lt.s32.totalorder %s348_s23, %s348_s23 }
  0x13   :  { %p355_p8 = por %p354_p7, %p353_p6 }
  0x15   :  { %p356_p9 = pnand %p355_p8, %p349_p5 }
  0x17   :  { %359 = shalt.err (!%p356_p9)
}
  0x18   :  { %20 = dma.hbm_to_vmem [thread:$0]  %s457_s0, 32, %s18_s20, [#allocation3]  }
  0x19   :  { %s368_s26 = scalar_lea.vmem %s39_s22, 512  ;;  %p373_p11 = scmp.lt.s32.totalorder %s39_s22, %s39_s22 }
  0x1a   :  { %p369_p10 = scmp.ne.s32.totalorder %s39_s22, %s368_s26  ;;  %p374_p12 = scmp.lt.s32.totalorder %s368_s26, %s368_s26 }
  0x1c   :  { %p375_p13 = por %p374_p12, %p373_p11 }
  0x1e   :  { %p376_p0 = pnand %p375_p13, %p369_p10 }
  0x20   :  { %379 = shalt.err (!%p376_p0)
}
  0x21   :  { %44 = dma.hbm_to_vmem [thread:$0]  %s459_s2, 512, %s39_s22, [#allocation6], %s407_s15, %s407_s15, %s408_s16  }
  0x22   :  { %400 = dma.done.wait [#allocation3], 32  }
  0x23   :  { %401 = vsyncadd [#allocation3], 4294967264 }
  0x24   :  { %402 = dma.done.wait [#allocation6], 768  }
  0x25   :  { %403 = vsyncadd [#allocation6], 4294966528  ;;  %v411_v0 = vmov 0.0   ;;  %vm412_vm0 = vmmov 0   ;;  %v60_v1 = vld [vmem:[#allocation7 + $0x18] sm:$0xff]  ;;  %v59_v2 = vld [vmem:[#allocation7 + $0x10] sm:$0xff]  ;;  %v139_v8 = vlaneseq }
  0x26   :  { %289 = vmatprep.subr.mxu0 %v411_v0  ;;  %297 = vmatprep.mubr.msk.f32.mxu0 %vm412_vm0, %v411_v0  ;;  %v58_v3 = vld [vmem:[#allocation7 + $0x8] sm:$0xff]  ;;  %v57_v4 = vld [vmem:[#allocation7] sm:$0xff]  ;;  %vm61_vm1 = vcmask 261120   ;;  %v413_v6 = vmov 1966171168   ;;  %v55_v18 = vld [vmem:[#allocation5] sm:$0xff] }
  0x27   :  { %290 = vmatpush3.msra.mxu0 %v60_v1  ;;  %v54_v5 = vld [vmem:[#allocation2] sm:$0x3]  ;;  %v137_v7 = vunpack.c.l.s4 %v413_v6  ;;  %v140_v10 = vshrl.u32 %v139_v8, 7  ;;  %v56_v21 = vld [vmem:[#allocation5 + $0x8] sm:$0xff]  ;;  %v179_v27 = vand.u32 127, %v139_v8  ;;  %vm188_vm2 = vcmask 1041409  }
  0x28   :  { %291 = vmatprep.subr.mxu0 %v411_v0  ;;  %vm191_vm3 = vcmask 58368   ;;  %v414_v35 = vmov 0   ;;  %s415_s0 = smov [#allocation8]  }
  0x29   :  { %292 = vmatpush3.msra.mxu0 %v59_v2  ;;  %v138_v9 = vunpack.c.0.s8 %v137_v7  ;;  %v160_v14 = vsub.s32 0, %v140_v10  ;;  %v182_v29 = vsub.s32 %v179_v27, %v140_v10  ;;  %311 = vset.pattern.permute.xlu0 %v414_v35  ;;  %v202_v36 = vsub.s32 1, %v140_v10  ;;  %s273_s2 = sshll.u32 %s415_s0, 4  ;;  %s274_s2 = int_to_ptr.vmem [resolvable:$true] %s273_s2 }
  0x2a   :  { %293 = vmatprep.subr.mxu0 %v411_v0  ;;  %310 = vset.pattern.permute.xlu1 %v414_v35  ;;  %s380_s28 = scalar_lea.vmem %s274_s2, 32  ;;  %p385_p2 = scmp.lt.s32.totalorder %s274_s2, %s274_s2 }
  0x2b   :  { %294 = vmatpush3.msra.mxu0 %v58_v3  ;;  %v141_v11 = vsub.s32 %v138_v9, %v140_v10  ;;  %p381_p1 = scmp.ne.s32.totalorder %s274_s2, %s380_s28  ;;  %p386_p3 = scmp.lt.s32.totalorder %s380_s28, %s380_s28 }
  0x2c   :  { %295 = vmatprep.subr.mxu0 %v411_v0 }
  0x2d   :  { %296 = vmatpush3.msra.mxu0 %v57_v4  ;;  %p387_p4 = por %p386_p3, %p385_p2 }
  0x2e   :  { %298 = vmatmul.mubr.msk.f32.vlgmr.msra.gmra.mxu0 %vm61_vm1, %v54_v5 }
  0x2f   :  { %p388_p5 = pnand %p387_p4, %p381_p1 }
  0xee   :  { %v131_v12 = vpop.f32.mrf.mxu0 }
  0xef   :  { %v142_v13 = vrot.slane %v131_v12, %v141_v11 }
  0xf0   :  { %v299_v15 = vpop.f32.mrf.mxu0 }
  0xf1   :  { %v143_v16 = vcombine.high %v142_v13, %v142_v13  ;;  %v150_v17 = vrot.slane %v142_v13, %v141_v11 }
  0xf3   :  { %v157_v19 = vrot.slane %v143_v16, %v141_v11  ;;  %v161_v20 = vrot.slane %v150_v17, %v160_v14 }
  0xf5   :  { %v168_v22 = vmul.f32 %v161_v20, %v55_v18  ;;  %v165_v23 = vrot.slane %v157_v19, %v160_v14 }
  0xf7   :  { %v170_v24 = vsel %vm61_vm1, %v168_v22, 0.0  ;;  %v169_v25 = vmul.f32 %v165_v23, %v56_v21 }
  0xf8   :  { %171 = vadd.xlane.f32.xlu0 %v170_v24 }
  0xf9   :  { %v173_v26 = vsel %vm61_vm1, %v169_v25, 0.0 }
  0xfc   :  { %174 = vadd.xlane.f32.xlu0 %v173_v26 }
 0x181   :  { %v172_v28 = vpop.xlane.xlu0 %171 }
 0x182   :  { %v183_v31 = vrot.slane %v172_v28, %v182_v29 }
 0x185   :  { %v175_v30 = vpop.xlane.xlu0 %174 }
 0x186   :  { %v187_v32 = vrot.slane %v175_v30, %v182_v29 }
 0x188   :  { %v189_v33 = vsel %vm188_vm2, %v187_v32, %v183_v31 }
 0x189   :  { %v192_v34 = vsel %vm191_vm3, %v189_v33, -inf }
 0x18a   :  { %193 = vmax.xlane.f32.xlu1 %v192_v34 }
 0x213   :  { %v194_v37 = vpop.xlane.xlu1 %193 }
 0x214   :  { %v199_v38 = vrot.slane %v194_v37, %v160_v14  ;;  %v203_v39 = vrot.slane %v194_v37, %v202_v36 }
 0x216   :  { %v206_v40 = vsub.f32 %v172_v28, %v199_v38  ;;  %v207_v41 = vsub.f32 %v175_v30, %v203_v39 }
 0x218   :  { %v208_v42 = vmul.f32 1.442695, %v206_v40  ;;  %v210_v43 = vmul.f32 1.442695, %v207_v41 }
 0x21a   :  { %312 = vpow2.f32 %v208_v42 }
 0x21b   :  { %314 = vpow2.f32 %v210_v43 }
 0x227   :  { %v313_v44 = vpop.eup %312 }
 0x228   :  { %v315_v45 = vpop.eup %314  ;;  %215 = vperm.xlu1 %310, %v313_v44  }
 0x229   :  { %218 = vperm.xlu0 %311, %v315_v45  }
 0x2a3   :  { %v216_v46 = vpop.permute.xlu1 %215 }
 0x2a4   :  { %v219_v47 = vpop.permute.xlu0 %218  ;;  %v223_v48 = vrot.slane %v216_v46, %v182_v29 }
 0x2a5   :  { %v227_v49 = vrot.slane %v219_v47, %v182_v29 }
 0x2a7   :  { %v228_v50 = vsel %vm188_vm2, %v227_v49, %v223_v48 }
 0x2a8   :  { %v230_v51 = vsel %vm191_vm3, %v228_v50, 0.0 }
 0x2a9   :  { %231 = vadd.xlane.f32.xlu1 %v230_v51 }
 0x332   :  { %v232_v52 = vpop.xlane.xlu1 %231 }
 0x333   :  { %v237_v53 = vrot.slane %v232_v52, %v160_v14  ;;  %v241_v54 = vrot.slane %v232_v52, %v202_v36 }
 0x335   :  { %316 = vrcp.f32 %v237_v53 }
 0x336   :  { %318 = vrcp.f32 %v241_v54 }
 0x342   :  { %v317_v55 = vpop.eup %316 }
 0x343   :  { %v245_v56 = vmul.f32 %v317_v55, %v313_v44  ;;  %v319_v57 = vpop.eup %318 }
 0x344   :  { %v247_v58 = vmul.f32 %v319_v57, %v315_v45 }
 0x345   :  { %251 = vperm.xlu0 %311, %v245_v56  }
 0x349   :  { %254 = vperm.xlu0 %311, %v247_v58  }
 0x3c0   :  { %v252_v59 = vpop.permute.xlu0 %251 }
 0x3c1   :  { %v259_v61 = vrot.slane %v252_v59, %v182_v29 }
 0x3c4   :  { %v255_v60 = vpop.permute.xlu0 %254 }
 0x3c5   :  { %v263_v62 = vrot.slane %v255_v60, %v182_v29 }
 0x3c7   :  { %v264_v63 = vsel %vm188_vm2, %v263_v62, %v259_v61 }
 0x3c8   :  { %266 = vst.msk [vmem:[#allocation8] sm:$0x3] %vm191_vm3, %v264_v63 }
 0x3c9   :  { %391 = shalt.err (!%p388_p5)
}
 0x3ca   :  { %276 = dma.vmem_to_hbm [thread:$0]  %s274_s2, 32, %s460_s3, [#allocation4]  }
 0x3cb   :  { %404 = dma.done.wait [#allocation4], 32  }
 0x3cc   :  { %405 = vsyncadd [#allocation4], 4294967264 }
 0x3cd   :  { %280 = vsyncpa [#allocation3], 1 }
 0x3ce   :  { %281 = vsyncpa [#allocation6], 1 }
 0x3cf   :  { %282 = vsyncpa [#allocation4], 1 }

</bundles_post_ra>
